<compile_context>
chip_gen: v5e
topology: v5e:2x2
jax: 0.10.0
libtpu: 0.0.40
codegen_flags: <defaults>
</compile_context>

<pallas_src>
import math

import jax
import jax.numpy as jnp
from jax.experimental import pallas as pl
from jax.experimental.pallas import tpu as pltpu


# ---------------------------------------------------------------------------
# Plain-XLA path (tiny inputs, or shapes where a pad-free reshape is not
# possible).  A single fused elementwise multiply is already at HBM roofline.
# ---------------------------------------------------------------------------
def _transform_annot_xla(annots: jax.Array, scale_h: float, scale_w: float) -> jax.Array:
    n, c = annots.shape
    col = jnp.arange(c)
    scale_row = jnp.where(
        col >= 6,
        jnp.float32(1.0),
        jnp.where(col % 2 == 0, jnp.float32(scale_w), jnp.float32(scale_h)),
    )
    return (annots * scale_row).astype(annots.dtype)


# ---------------------------------------------------------------------------
# Pallas path: lane-dense pad-free slab, row-tiled, precomputed scale row,
# aliased output.
# ---------------------------------------------------------------------------
def _transform_annot_pallas(
    annots: jax.Array,
    scale_h: float,
    scale_w: float,
    *,
    target_tile_bytes: int = 4 * 1024 * 1024,   # 2 bufs x (in + out) = 16 MiB footprint
    min_grid_tiles: int = 4,                    # keep both v7x TensorCores busy
) -> jax.Array:
    n, c = annots.shape
    assert c >= 6, "annots must have at least 6 columns"
    dtype = annots.dtype
    itemsize = jnp.dtype(dtype).itemsize

    # Lane-dense width: smallest multiple of 128 that is also a multiple of C,
    # so the per-column scale pattern is identical on every slab row.
    lane_w = (c * 128) // math.gcd(c, 128)
    total = n * c
    assert total % lane_w == 0, "caller must guarantee a pad-free reshape"
    rows = total // lane_w

    # Free relayout of the contiguous row-major array (no pad, no slice;
    # bitcast-reshape under jit).
    x2d = annots.reshape(rows, lane_w)

    # Precompute the (1, lane_w) f32 scale row once in the wrapper; lane_w is a
    # multiple of C, so the pattern is exact for every slab row.
    col = jnp.arange(lane_w, dtype=jnp.int32) % c
    scale_row = jnp.where(
        col >= 6,
        jnp.float32(1.0),
        jnp.where(col % 2 == 0, jnp.float32(scale_w), jnp.float32(scale_h)),
    ).reshape(1, lane_w)

    # Row tile: multiple of 8 (sublane), capped by a ~4 MiB byte budget and by
    # a "give the megacore >= min_grid_tiles tiles" constraint.
    if rows < 8:
        tile_rows = rows                       # full-extent block (allowed)
    else:
        byte_cap = max(8, (target_tile_bytes // (lane_w * itemsize)) // 8 * 8)
        split_cap = max(8, ((rows // min_grid_tiles) // 8) * 8)
        tile_rows = min(byte_cap, split_cap, (rows // 8) * 8)
    grid_rows = pl.cdiv(rows, tile_rows)       # partial last block is masked

    def kernel(scale_ref, x_ref, o_ref):
        # One vmul (+ cast); scale_ref is (1, lane_w) f32, broadcast on sublanes.
        o_ref[...] = (x_ref[...] * scale_ref[...]).astype(o_ref.dtype)

    out2d = pl.pallas_call(
        kernel,
        out_shape=jax.ShapeDtypeStruct((rows, lane_w), dtype),
        grid=(grid_rows,),
        in_specs=[
            # Constant block index -> the scale row is DMA'd once, not per step.
            pl.BlockSpec((1, lane_w), lambda i: (0, 0)),
            pl.BlockSpec((tile_rows, lane_w), lambda i: (i, 0)),
        ],
        out_specs=pl.BlockSpec((tile_rows, lane_w), lambda i: (i, 0)),
        input_output_aliases={1: 0},            # write back into the data buffer
        compiler_params=pltpu.CompilerParams(
            dimension_semantics=("parallel",),  # shard tiles across TCs (v7x)
            vmem_limit_bytes=32 * 1024 * 1024,  # explicit (v5e default is 16 MiB)
        ),
    )(scale_row, x2d)

    return out2d.reshape(n, c)


# ---------------------------------------------------------------------------
# Public wrapper: mirrors TransformAnnot.forward (functional output).
# ---------------------------------------------------------------------------
def transform_annot(
    annots: jax.Array,
    scale_h: float,
    scale_w: float,
    *,
    min_pallas_elems: int = 1 << 20,   # fused XLA multiply is at roofline below this
) -> jax.Array:
    annots = jnp.asarray(annots)
    assert annots.ndim == 2 and annots.shape[1] >= 6
    if not jnp.issubdtype(annots.dtype, jnp.floating):
        # Integer dtypes would truncate the scales (0.25 -> 0); promote once.
        annots = annots.astype(jnp.float32)

    n, c = annots.shape
    lane_w = (c * 128) // math.gcd(c, 128)
    total = n * c
    if total < min_pallas_elems or total % lane_w != 0:
        # Tiny input, or a pad/slice would re-stream the whole array in the
        # wrapper (each is a full HBM read+write): use the fused XLA multiply.
        return _transform_annot_xla(annots, scale_h, scale_w)
    return _transform_annot_pallas(annots, scale_h, scale_w)
    # TODO(synk): torch.from_numpy / in-place numpy mutation has no JAX
    # equivalent; the result is returned functionally (the Pallas path aliases
    # the staged buffer via input_output_aliases).


def _reference(annots: jax.Array, scale_h: float, scale_w: float) -> jax.Array:
    ref = annots.at[:, jnp.array([0, 2, 4])].multiply(scale_w)
    ref = ref.at[:, jnp.array([1, 3, 5])].multiply(scale_h)
    return ref


if __name__ == "__main__":
    key = jax.random.PRNGKey(0)
    k1, k2, k3, k4 = jax.random.split(key, 4)
    scale_h, scale_w = 0.5, 0.25

    # 1) Module-scale tiny input (8 annotations x 6 coords): plain-XLA path.
    small = jax.random.uniform(k1, (8, 6), dtype=jnp.float32) * 100.0
    out_small = jax.block_until_ready(transform_annot(small, scale_h, scale_w))
    assert jnp.allclose(out_small, _reference(small, scale_h, scale_w),
                        rtol=1e-6, atol=1e-6), "small mismatch"

    # 2) Pallas path, C=6: total % lane_w == 0 (pad-free reshape), rows=35,
    #    tile_rows=8, grid=5 with a masked partial last block.
    big6 = jax.random.uniform(k2, (2240, 6), dtype=jnp.float32) * 100.0
    out6 = jax.block_until_ready(_transform_annot_pallas(big6, scale_h, scale_w))
    assert out6.shape == big6.shape
    assert jnp.allclose(out6, _reference(big6, scale_h, scale_w),
                        rtol=1e-6, atol=1e-6), "pallas c=6 mismatch"

    # 3) Pallas path, C=7: 7th column must stay untouched; lane_w=896, rows=14,
    #    grid=2 with a masked partial last block.
    big7 = jax.random.uniform(k3, (1792, 7), dtype=jnp.float32) * 100.0
    out7 = jax.block_until_ready(_transform_annot_pallas(big7, scale_h, scale_w))
    assert out7.shape == big7.shape
    assert jnp.allclose(out7, _reference(big7, scale_h, scale_w),
                        rtol=1e-6, atol=1e-6), "pallas c=7 mismatch"

    # 4) bf16 data stays bf16 (half the HBM traffic); scales are powers of two
    #    so both paths are exact.
    bigb = (jax.random.uniform(k4, (2240, 6), dtype=jnp.float32) * 100.0).astype(jnp.bfloat16)
    outb = jax.block_until_ready(_transform_annot_pallas(bigb, scale_h, scale_w))
    assert outb.dtype == jnp.bfloat16
    assert jnp.allclose(outb.astype(jnp.float32),
                        _reference(bigb, scale_h, scale_w).astype(jnp.float32),
                        rtol=1e-2, atol=1e-2), "pallas bf16 mismatch"

    # 5) Public wrapper with a shape whose total is NOT a multiple of lane_w:
    #    routes to the XLA path (no pad/slice copies).
    odd = jax.random.uniform(k2, (2051, 7), dtype=jnp.float32) * 100.0
    out_odd = jax.block_until_ready(transform_annot(odd, scale_h, scale_w))
    assert jnp.allclose(out_odd, _reference(odd, scale_h, scale_w),
                        rtol=1e-6, atol=1e-6), "xla fallback mismatch"

    print("KERNEL_OK")
</pallas_src>

<mosaic_0001>
module attributes {stable_mosaic.version = 11 : i64} {
  func.func @kernel(%arg0: i32, %arg1: memref<1x384xf32, #tpu.memory_space<vmem>>, %arg2: memref<8x384xf32, #tpu.memory_space<vmem>>, %arg3: memref<8x384xf32, #tpu.memory_space<vmem>>) attributes {dimension_semantics = [#tpu.dimension_semantics<parallel>], iteration_bounds = array<i64: 5>, scalar_prefetch = 0 : i64, scratch_operands = 0 : i64, tpu.core_type = #tpu.core_type<tc>, window_params = [{pipeline_mode = #tpu.pipeline_mode<synchronous>, transform_indices = @transform_0, window_bounds = array<i64: 1, 384>}, {transform_indices = @transform_1, window_bounds = array<i64: 8, 384>}, {transform_indices = @transform_2, window_bounds = array<i64: 8, 384>}]} {
    %c0 = arith.constant 0 : index
    %c0_0 = arith.constant 0 : index
    %0 = vector.load %arg2[%c0, %c0_0] : memref<8x384xf32, #tpu.memory_space<vmem>>, vector<8x384xf32>
    %c0_1 = arith.constant 0 : index
    %c0_2 = arith.constant 0 : index
    %1 = vector.load %arg1[%c0_1, %c0_2] : memref<1x384xf32, #tpu.memory_space<vmem>>, vector<1x384xf32>
    %2 = vector.broadcast %1 : vector<1x384xf32> to vector<8x384xf32>
    %3 = arith.mulf %0, %2 : vector<8x384xf32>
    %c0_3 = arith.constant 0 : index
    %c0_4 = arith.constant 0 : index
    %4 = vector.load %arg3[%c0_3, %c0_4] : memref<8x384xf32, #tpu.memory_space<vmem>>, vector<8x384xf32>
    tpu.vector_store %arg3[%c0_3, %c0_4], %3 {strides = array<i32>} : memref<8x384xf32, #tpu.memory_space<vmem>>, vector<8x384xf32>,
    return
  }
  func.func @transform_0(%arg0: i32) -> (i32, i32) {
    %c0_i32 = arith.constant 0 : i32
    %c0_i32_0 = arith.constant 0 : i32
    %c0_i32_1 = arith.constant 0 : i32
    return %c0_i32, %c0_i32_0 : i32, i32
  }
  func.func @transform_1(%arg0: i32) -> (i32, i32) {
    %c0_i32 = arith.constant 0 : i32
    %c0_i32_0 = arith.constant 0 : i32
    return %arg0, %c0_i32 : i32, i32
  }
  func.func @transform_2(%arg0: i32) -> (i32, i32) {
    %c0_i32 = arith.constant 0 : i32
    %c0_i32_0 = arith.constant 0 : i32
    return %arg0, %c0_i32 : i32, i32
  }
}

</mosaic_0001>

<bundles_post_ra>
// kernel: tpu_custom_call.1
= control target key start
LH: loop header
LB: loop body
LE: loop exit
PB: predicated region body
PF: predicated region fallthrough
CT: control target
= control target key end

     0   :  { %7 = vsyncpa [#allocation3], 0  ;;  %s555_s0 = inlined_call_operand.vmem [shape: f32[1,384], index: 0, kind: input, shape index: {}]   ;;  %s556_s1 = inlined_call_operand.hbm [shape: f32[35,384], index: 1, kind: input, shape index: {}, may-alias: {1,2}]   ;;  %s557_s2 = inlined_call_operand.hbm [shape: f32[35,384], index: 2, kind: output, shape index: {}, may-alias: {1,2}]  }
   0x1   :  { %9 = vsyncpa [#allocation3 + $0x1], 0 }
   0x2   :  { %10 = vsyncpa [#allocation4], 0 }
   0x3   :  { %12 = vsyncpa [#allocation4 + $0x1], 0  ;;  %s437_s9 = smov 0   ;;  %s439_s10 = smov 0  }
   0x4   :  { %s441_s11 = smov 0   ;;  %s443_s12 = smov 0  }
   0x5 LB: > { %s458_s13 = sadd.s32 4294967295, %s420_s12   ;;  %s266_s14 = sadd.s32 4294967294, %s420_s12   ;;  %s420_s12 = sphi %s443_s12, %s565_s12   ;;  %s416_s11 = sphi %s441_s11, %s564_s11   ;;  %s412_s10 = sphi %s439_s10, %s563_s10   ;;  %s408_s9 = sphi %s437_s9, %s562_s9  }
   0x6   : > { %s462_s15 = sadd.s32 1, %s420_s12   ;;  %s46_s16 = sadd.s32 1, %s416_s11 }
   0x7   : > { %s43_s17 = ssub.s32 %s420_s12, %s462_s15  ;;  %p53_p0 = scmp.ne.s32.totalorder %s416_s11, %s412_s10 }
   0x8   : > { %p44_p1 = scmp.eq.s32.totalorder %s43_s17, 0  ;;  %p54_p2 = scmp.eq.s32.totalorder %s420_s12, 0 }
   0x9   : > { %p59_p3 = scmp.ne.s32.totalorder %s412_s10, %s408_s9  ;;  %p60_p4 = scmp.eq.s32.totalorder %s458_s13, 0 }
   0xa   : > { %s474_s18 = scalar_select %p44_p1, %s416_s11, %s46_s16  }
   0xb   : > { %p55_p5 = por %p54_p2, %p53_p0  ;;  %p476_p6 = por %p60_p4, %p59_p3 }
   0xc   : > { %p83_p7 = scmp.eq.s32.totalorder %s458_s13, 4  ;;  %p89_p8 = scmp.eq.s32.totalorder %s266_s14, 4 }
   0xd   : > { %p290_p9 = scmp.lt.s32.totalorder %s420_s12, 5  ;;  %s112_s22 = sand.u32 1, %s416_s11  }
   0xe   : > { %p482_p10 = por %p83_p7, %p53_p0  ;;  %p486_p11 = por %p89_p8, %p59_p3 }
   0xf   : > { %s275_s23 = smul.u32 24, %s420_s12  ;;  %p495_p12 = pnand %p290_p9, %p55_p5 }
  0x10   : > { %s274_s24 = smul.u32 24, %s112_s22  ;;  %s113_s4 = scalar_lea.sflag [#allocation3], %s112_s22 }
  0x11   : > { %s121_s27 = scalar_lea.hbm %s556_s1, %s275_s23  ;;  %p328_p0 = pneg %p495_p12 }
  0x12   : > { %s123_s29 = sshll.u32 %s121_s27, 4  ;;  %s116_s30 = scalar_lea.vmem [#allocation2], %s274_s24  ;;  %s124_s29 = int_to_ptr.hbm [resolvable:$true] %s123_s29 }
  0x13   : > { %s125_s3 = sshll.u32 %s116_s30, 4  ;;  %s324_s5 = sshra.s32 %s124_s29, 4  ;;  %s126_s3 = int_to_ptr.vmem [resolvable:$true] %s125_s3  ;;  %s325_s5 = int_to_ptr.hbm [resolvable:$true] %s324_s5 }
  0x14   : > { %s326_s6 = scalar_lea.hbm %s325_s5, 24  ;;  %s331_s14 = scalar_lea.hbm %s556_s1, 120 }
  0x15   : > { %p327_p13 = scmp.ne.s32.totalorder %s325_s5, %s326_s6  ;;  %p332_p3 = scmp.lt.s32.totalorder %s325_s5, %s556_s1 }
  0x16   : > { %p333_p4 = scmp.lt.s32.totalorder %s331_s14, %s326_s6 }
  0x17   : > { %p329_p1 = pnand %p328_p0, %p327_p13 }
  0x18   : > { %p334_p5 = por %p333_p4, %p332_p3 }
  0x19   : > { %p330_p2 = pneg %p329_p1 }
  0x1b   : > { %p335_p7 = pnand %p334_p5, %p330_p2 }
  0x1d   : > { %338 = shalt.err (!%p335_p7)
}
  0x1e   : > { %285 = dma.hbm_to_vmem [thread:$0]  (!%p495_p12), %s124_s29, 384, %s126_s3, %s113_s4  }
  0x1f   : > { %p270_p8 = scmp.ge.s32.totalorder %s420_s12, 1  ;;  %p130_p9 = scmp.lt.s32.totalorder %s420_s12, 6 }
  0x21   : > { %p131_p13 = pnand %p270_p8, %p130_p9 }
  0x22   : > { %s512_s22 = sand.u32 (!%p131_p13), 1, %s412_s10  }
  0x23   : > { %134 = sbr.rel (%p131_p13) target bundleno = 57 (0x39), region = 28  ;;  %s137_s24 = scalar_lea.sflag (!%p131_p13), [#allocation3], %s512_s22 }
  0x24   : > { %s276_s23 = smul.u32 (!%p131_p13), 24, %s512_s22 }
  0x26   : > { %s140_s25 = scalar_lea.vmem (!%p131_p13), [#allocation2], %s276_s23 }
  0x28   : > { %399 = dma.done.wait (%p476_p6), %s137_s24, 384  }
  0x29   : > { %401 = vsyncadd (%p476_p6), %s137_s24, 4294966912  ;;  %s277_s26 = smul.u32 24, %s458_s13  ;;  %v162_v0 = vld [vmem:[%s140_s25] sm:$0xff]  ;;  %v163_v2 = vld [vmem:[%s140_s25 + $0x8] sm:$0xff]  ;;  %s161_s4 = scalar_lea.vmem [#allocation5], %s276_s23 }
  0x2a   : > { %v165_v1 = vld [vmem:[%s555_s0] sm:$0x7]  ;;  %v164_v5 = vld [vmem:[%s140_s25 + $0x10] sm:$0xff]  ;;  %s193_s19 = sshll.u32 %s161_s4, 4  ;;  %s180_s13 = scalar_lea.sflag [#allocation4], %s512_s22  ;;  %s194_s19 = int_to_ptr.vmem [resolvable:$true] %s193_s19 }
  0x2b   : > { %s191_s29 = scalar_lea.hbm %s557_s2, %s277_s26  ;;  %v167_v3 = vperm.slane %v165_v1, 0  ;;  %v168_v4 = vperm.slane %v165_v1, 1  ;;  %v169_v6 = vperm.slane %v165_v1, 2  ;;  %s374_s16 = scalar_lea.hbm %s557_s2, 120 }
  0x2c   : > { %s195_s5 = sshll.u32 %s191_s29, 4  ;;  %s196_s5 = int_to_ptr.hbm [resolvable:$true] %s195_s5 }
  0x2d   : > { %v173_v7 = vmul.f32 %v167_v3, %v162_v0  ;;  %v174_v8 = vmul.f32 %v168_v4, %v163_v2  ;;  %v175_v9 = vmul.f32 %v169_v6, %v164_v5  ;;  %s368_s6 = sshra.s32 %s196_s5, 4  ;;  %s369_s6 = int_to_ptr.hbm [resolvable:$true] %s368_s6 }
  0x2e   : > { %s370_s7 = scalar_lea.hbm %s369_s6, 24  ;;  %p375_p1 = scmp.lt.s32.totalorder %s369_s6, %s557_s2 }
  0x2f   : > { %176 = vst [vmem:[%s161_s4] sm:$0xff] %v173_v7  ;;  %p371_p6 = scmp.ne.s32.totalorder %s369_s6, %s370_s7  ;;  %p376_p2 = scmp.lt.s32.totalorder %s374_s16, %s370_s7 }
  0x30   : > { %177 = vst [vmem:[%s161_s4 + $0x8] sm:$0xff] %v174_v8 }
  0x31   : > { %178 = vst [vmem:[%s161_s4 + $0x10] sm:$0xff] %v175_v9  ;;  %p372_p12 = pnand %p371_p6, %p482_p10  ;;  %p377_p3 = por %p376_p2, %p375_p1 }
  0x33   : > { %p373_p0 = pneg %p372_p12 }
  0x35   : > { %p378_p4 = pnand %p377_p3, %p373_p0 }
  0x37   : > { %381 = shalt.err (!%p378_p4)
}
  0x38   : > { %280 = dma.vmem_to_hbm [thread:$0]  (%p482_p10), %s194_s19, 384, %s196_s5, %s180_s13  }
  0x39 PF: > { %p291_p5 = scmp.ge.s32.totalorder %s420_s12, 2  ;;  %s207_s22 = sand.u32 1, %s408_s9  }
  0x3a   : > { %s208_s24 = scalar_lea.sflag [#allocation4], %s207_s22 }
  0x3b   : > { %p287_p7 = pnand %p291_p5, %p486_p11 }
  0x3d   : > { %p288_p8 = pneg %p287_p7 }
  0x3f   : > { %403 = dma.done.wait (%p288_p8), %s208_s24, 384  }
  0x40   : > { %405 = vsyncadd (%p288_p8), %s208_s24, 4294966912  ;;  %p15_p9 = scmp.ge.s32.totalorder %s462_s15, 7   ;;  %s562_s9 = smov %s412_s10 }
  0x41   : > { %s563_s10 = smov %s416_s11  ;;  %s564_s11 = smov %s474_s18 }
  0x42   : > { %s565_s12 = smov %s462_s15  ;;  %17 = sbr.rel (!%p15_p9) target bundleno = 5 (0x5), region = 73 }
  0x47   :  { %214 = vsyncpa [#allocation3], 1 }
  0x48   :  { %216 = vsyncpa [#allocation3 + $0x1], 1 }
  0x49   :  { %217 = vsyncpa [#allocation4], 1 }
  0x4a   :  { %219 = vsyncpa [#allocation4 + $0x1], 1 }

</bundles_post_ra>
